<compile_context>
chip_gen: v7x
topology: tpu7x:2x2x1
jax: 0.10.0
libtpu: 0.0.40
codegen_flags: <defaults>
</compile_context>

<pallas_src>
import math

import numpy as np

import jax
import jax.numpy as jnp
from jax.experimental import pallas as pl
from jax.experimental.pallas import tpu as pltpu


def bias_add_kernel(x_ref, w_ref, o_ref):
    # [TM, TF] + [1, TF] broadcast add; pure VPU, memory-bound.
    o_ref[...] = (x_ref[...] + w_ref[...]).astype(o_ref.dtype)


def _round_up(x, m):
    return -(-x // m) * m


def _round_down(x, m):
    return (x // m) * m


_TARGET_TILE_BYTES = 4 << 20    # ~4 MiB per streamed tile (roofline plateau)
_SMALL_PROBLEM_BYTES = 2 << 20  # below this a single block beats pipelining


def bias_add(inputs, weight, *, tile_m=None, tile_f=None):
    """Pallas TPU BiasAdd.forward: inputs + weight (bias over trailing dims).

    Output dtype follows jnp type promotion of (inputs, weight); with the
    module's factory kwargs both normally share a dtype.
    """
    w_nd = weight.ndim
    assert inputs.shape[inputs.ndim - w_nd:] == weight.shape, (
        "weight shape must match the trailing dims of inputs")

    F = int(np.prod(weight.shape)) if w_nd else 1
    lead = inputs.shape[: inputs.ndim - w_nd]
    M = int(np.prod(lead)) if lead else 1

    out_dtype = jnp.result_type(inputs.dtype, weight.dtype)
    itemsize = jnp.dtype(inputs.dtype).itemsize
    # Native sublane multiple per dtype packing: f32 -> 8, bf16 -> 16, i8/fp8 -> 32.
    sublane = {4: 8, 2: 16, 1: 32}.get(itemsize, 8)

    x = inputs.reshape(M, F)      # free row-major reshape (no HBM copy)
    w = weight.reshape(1, F)

    # Lane-dense folding: if F is not a multiple of 128, fold k consecutive
    # rows into the lane axis so every vreg / store uses all 128 lanes. The
    # reshape is free; tiling the bias k times is a one-time O(k*F) cost.
    if F % 128 != 0:
        k = 128 // math.gcd(F, 128)          # smallest k with (k*F) % 128 == 0
        if k > 1 and M % k == 0 and k * F * itemsize <= _TARGET_TILE_BYTES:
            x = x.reshape(M // k, k * F)
            w = jnp.tile(w, (1, k))
            M, F = M // k, k * F

    total_bytes = M * F * itemsize

    # Feature tiling only for extremely wide rows (keeps double-buffered VMEM
    # bounded and stores 128-lane dense); otherwise span the full feature dim.
    if tile_f is None:
        lane_budget = max(
            128, _round_down(_TARGET_TILE_BYTES // (sublane * itemsize), 128))
        tile_f = F if F <= lane_budget else lane_budget
    else:
        assert tile_f == F or tile_f % 128 == 0, (
            "tile_f must be a multiple of 128 or the full feature dim")

    # Row tiling: ~4 MiB per streamed tile, dtype-aware sublane rounding, no
    # wrapper-side padding (Pallas masks the ragged last block's writeback).
    if tile_m is None:
        tile_m = _TARGET_TILE_BYTES // max(tile_f * itemsize, 1)
        tile_m = max(sublane, _round_down(tile_m, sublane))
        if tile_m >= M:
            if total_bytes <= _SMALL_PROBLEM_BYTES or M <= 2 * sublane:
                tile_m = M           # single full-extent block (tiny problem)
            else:
                # Keep >= 2 grid steps so v7x's two TensorCores both get work.
                tile_m = max(sublane, _round_up(-(-M // 2), sublane))
    else:
        assert tile_m == M or tile_m % sublane == 0, (
            f"tile_m must be a multiple of {sublane} or the full row dim")

    grid = (pl.cdiv(M, tile_m), pl.cdiv(F, tile_f))

    cost = pl.CostEstimate(
        flops=M * F,
        transcendentals=0,
        bytes_accessed=(M * F * itemsize
                        + M * F * jnp.dtype(out_dtype).itemsize
                        + F * jnp.dtype(weight.dtype).itemsize),
    )

    out = pl.pallas_call(
        bias_add_kernel,
        out_shape=jax.ShapeDtypeStruct((M, F), out_dtype),
        grid_spec=pltpu.PrefetchScalarGridSpec(
            num_scalar_prefetch=0,
            grid=grid,
            in_specs=[
                pl.BlockSpec((tile_m, tile_f), lambda i, j: (i, j)),  # streamed rows
                pl.BlockSpec((1, tile_f), lambda i, j: (0, j)),       # resident bias
            ],
            out_specs=pl.BlockSpec((tile_m, tile_f), lambda i, j: (i, j)),
        ),
        compiler_params=pltpu.CompilerParams(
            # Independent tiles on both axes -> shard across v7x's 2 TCs.
            dimension_semantics=("parallel", "parallel"),
            # ~4 MiB tiles, double-buffered x + out ~= 16 MiB; 48 MiB is safe
            # on every generation (v7x physical VMEM is only 64 MiB per TC).
            vmem_limit_bytes=48 * 1024 * 1024,
        ),
        cost_estimate=cost,
    )(x, w)

    return out.reshape(inputs.shape)


if __name__ == "__main__":
    key = jax.random.PRNGKey(0)
    k1, k2, k3, k4 = jax.random.split(key, 4)

    # Small shapes consistent with the module: inputs [batch, seq, hidden],
    # bias over the hidden dim. hidden=32 exercises the lane-dense fold path
    # (4 rows folded into 128 lanes, unmasked stores).
    batch, seq, hidden = 2, 8, 32
    inputs = jax.random.normal(k1, (batch, seq, hidden), jnp.float32)

    # 1) Module-faithful init: nn.init.zeros_(weight).
    weight_zeros = jnp.zeros((hidden,), jnp.float32)
    out = jax.block_until_ready(bias_add(inputs, weight_zeros))
    assert out.shape == inputs.shape
    assert jnp.allclose(out, inputs + weight_zeros), "mismatch (zero bias)"

    # 2) Non-trivial weight to actually exercise the broadcast add.
    weight_rand = jax.random.normal(k2, (hidden,), jnp.float32)
    out2 = jax.block_until_ready(bias_add(inputs, weight_rand))
    assert jnp.allclose(out2, inputs + weight_rand, atol=1e-6, rtol=1e-6), \
        "mismatch (random bias)"

    # 3) Multi-step pipelined grid with a ragged last row-block (no wrapper
    #    pad / slice): M = 33*128 = 4224 rows, tile_m = 4096 -> 2 grid steps.
    big = jax.random.normal(k3, (33, 128, 256), jnp.float32)
    wbig = jax.random.normal(k2, (256,), jnp.float32)
    out3 = jax.block_until_ready(bias_add(big, wbig))
    assert jnp.allclose(out3, big + wbig, atol=1e-6, rtol=1e-6), \
        "mismatch (ragged multi-tile case)"

    # 4) bf16 path (sublane multiple 16) with lane-dense fold (160 -> 640 lanes).
    xb = jax.random.normal(k4, (4, 64, 160), jnp.float32).astype(jnp.bfloat16)
    wb = jax.random.normal(k2, (160,), jnp.float32).astype(jnp.bfloat16)
    out4 = jax.block_until_ready(bias_add(xb, wb))
    assert out4.dtype == jnp.bfloat16
    assert jnp.allclose(out4.astype(jnp.float32), (xb + wb).astype(jnp.float32),
                        atol=1e-2, rtol=1e-2), "mismatch (bf16 case)"

    print("KERNEL_OK")
</pallas_src>

<mosaic_0001>
module attributes {stable_mosaic.version = 11 : i64} {
  func.func @bias_add_kernel(%arg0: i32, %arg1: i32, %arg2: memref<4x128xf32, #tpu.memory_space<vmem>>, %arg3: memref<1x128xf32, #tpu.memory_space<vmem>>, %arg4: memref<4x128xf32, #tpu.memory_space<vmem>>) attributes {dimension_semantics = [#tpu.dimension_semantics<parallel>, #tpu.dimension_semantics<parallel>], iteration_bounds = array<i64: 1, 1>, scalar_prefetch = 0 : i64, scratch_operands = 0 : i64, tpu.core_type = #tpu.core_type<tc>, window_params = [{transform_indices = @transform_0, window_bounds = array<i64: 4, 128>}, {transform_indices = @transform_1, window_bounds = array<i64: 1, 128>}, {transform_indices = @transform_2, window_bounds = array<i64: 4, 128>}]} {
    %c0 = arith.constant 0 : index
    %c0_0 = arith.constant 0 : index
    %0 = vector.load %arg2[%c0, %c0_0] : memref<4x128xf32, #tpu.memory_space<vmem>>, vector<4x128xf32>
    %c0_1 = arith.constant 0 : index
    %c0_2 = arith.constant 0 : index
    %1 = vector.load %arg3[%c0_1, %c0_2] : memref<1x128xf32, #tpu.memory_space<vmem>>, vector<1x128xf32>
    %2 = vector.broadcast %1 : vector<1x128xf32> to vector<4x128xf32>
    %3 = arith.addf %0, %2 : vector<4x128xf32>
    %c0_3 = arith.constant 0 : index
    %c0_4 = arith.constant 0 : index
    %4 = vector.load %arg4[%c0_3, %c0_4] : memref<4x128xf32, #tpu.memory_space<vmem>>, vector<4x128xf32>
    tpu.vector_store %arg4[%c0_3, %c0_4], %3 {strides = array<i32>} : memref<4x128xf32, #tpu.memory_space<vmem>>, vector<4x128xf32>,
    return
  }
  func.func @transform_0(%arg0: i32, %arg1: i32) -> (i32, i32) {
    %c0_i32 = arith.constant 0 : i32
    return %arg0, %arg1 : i32, i32
  }
  func.func @transform_1(%arg0: i32, %arg1: i32) -> (i32, i32) {
    %c0_i32 = arith.constant 0 : i32
    %c0_i32_0 = arith.constant 0 : i32
    return %c0_i32, %arg1 : i32, i32
  }
  func.func @transform_2(%arg0: i32, %arg1: i32) -> (i32, i32) {
    %c0_i32 = arith.constant 0 : i32
    return %arg0, %arg1 : i32, i32
  }
}

</mosaic_0001>

<bundles_post_ra>
// kernel: tpu_custom_call.1
= control target key start
LH: loop header
LB: loop body
LE: loop exit
PB: predicated region body
PF: predicated region fallthrough
CT: control target
= control target key end

     0   :  { %7 = vsyncpa [#allocation3], 0  ;;  %s144_s0 = inlined_call_operand.hbm [shape: f32[4,128], index: 0, kind: input, shape index: {}]   ;;  %s145_s1 = inlined_call_operand.vmem [shape: f32[1,128], index: 1, kind: input, shape index: {}]   ;;  %s146_s2 = inlined_call_operand.hbm [shape: f32[4,128], index: 2, kind: output, shape index: {}]  }
   0x1   :  { %8 = vsyncpa [#allocation4], 0  ;;  %s100_s9 = smov [#allocation2]   ;;  %s52_s13 = scalar_lea.hbm %s144_s0, 64 }
   0x2   :  { %s15_s10 = sshll.u32 %s100_s9, 4  ;;  %p53_p0 = scmp.ne.s32.totalorder %s144_s0, %s52_s13  ;;  %s16_s10 = int_to_ptr.vmem [resolvable:$true] %s15_s10 }
   0x3   :  { %p56_p1 = scmp.lt.u32.totalorder %s52_s13, %s144_s0 }
   0x5   :  { %p58_p2 = pnand %p56_p1, %p53_p0 }
   0x7   :  { %61 = shalt.err (!%p58_p2)
}
   0x8   :  { %s62_s18 = scalar_lea.vmem %s16_s10, 64  ;;  %p67_p4 = scmp.lt.s32.totalorder %s16_s10, %s16_s10 }
   0x9   :  { %p63_p3 = scmp.ne.s32.totalorder %s16_s10, %s62_s18  ;;  %p68_p5 = scmp.lt.s32.totalorder %s62_s18, %s62_s18 }
   0xb   :  { %p69_p6 = por %p68_p5, %p67_p4 }
   0xd   :  { %p70_p7 = pnand %p69_p6, %p63_p3 }
   0xf   :  { %73 = shalt.err (!%p70_p7)
}
  0x10   :  { %18 = dma.hbm_to_vmem [thread:$0]  %s144_s0, 64, %s16_s10, [#allocation3]  }
  0x11   :  { %96 = dma.done.wait [#allocation3], 64  }
  0x12   :  { %97 = vsyncadd [#allocation3], 4294967232  ;;  %s101_s21 = smov [#allocation5]   ;;  %v24_v0 = vld [vmem:[#allocation2] sm:$0xf] }
  0x13   :  { %s40_s22 = sshll.u32 %s101_s21, 4  ;;  %v49_v1 = vld [vmem:[%s145_s1] ss:$0 sm:$0xff]  ;;  %s41_s22 = int_to_ptr.vmem [resolvable:$true] %s40_s22 }
  0x14   :  { %v32_v2 = vadd.f32 %v49_v1, %v24_v0  ;;  %s74_s25 = scalar_lea.vmem %s41_s22, 64  ;;  %p79_p9 = scmp.lt.s32.totalorder %s41_s22, %s41_s22 }
  0x15   :  { %p75_p8 = scmp.ne.s32.totalorder %s41_s22, %s74_s25  ;;  %p80_p10 = scmp.lt.s32.totalorder %s74_s25, %s74_s25 }
  0x16   :  { %33 = vst [vmem:[#allocation5] sm:$0xf] %v32_v2 }
  0x17   :  { %p81_p11 = por %p80_p10, %p79_p9 }
  0x19   :  { %p82_p12 = pnand %p81_p11, %p75_p8 }
  0x1b   :  { %85 = shalt.err (!%p82_p12)
}
  0x1c   :  { %s86_s27 = scalar_lea.hbm %s146_s2, 64 }
  0x1d   :  { %p87_p13 = scmp.ne.s32.totalorder %s146_s2, %s86_s27  ;;  %p90_p0 = scmp.lt.u32.totalorder %s86_s27, %s146_s2 }
  0x1f   :  { %p92_p1 = pnand %p90_p0, %p87_p13 }
  0x21   :  { %95 = shalt.err (!%p92_p1)
}
  0x22   :  { %43 = dma.vmem_to_hbm [thread:$0]  %s41_s22, 64, %s146_s2, [#allocation4]  }
  0x23   :  { %98 = dma.done.wait [#allocation4], 64  }
  0x24   :  { %99 = vsyncadd [#allocation4], 4294967232 }
  0x25   :  { %47 = vsyncpa [#allocation3], 1 }
  0x26   :  { %48 = vsyncpa [#allocation4], 1 }

</bundles_post_ra>
